<compile_context>
chip_gen: v5e
topology: v5e:2x2
jax: 0.10.0
libtpu: 0.0.40
codegen_flags: <defaults>
</compile_context>

<pallas_src>
import jax
import jax.numpy as jnp
from jax.experimental import pallas as pl
from jax.experimental.pallas import tpu as pltpu

_EPS = 1e-12  # torch.nn.functional.normalize default


def _fit_block(desired, full, align):
    """Largest block <= desired that is a multiple of `align` or equals `full`."""
    if full <= desired or full <= align:
        return full
    t = (min(desired, full) // align) * align
    return max(t, align)


def _footprint_bytes(tm, tn, tk, xsz, wsz, osz):
    bufs = 2 * (tm * tk * xsz + tn * tk * wsz + tm * tn * osz)  # double-buffered I/O
    scratch = tm * tn * 4 + tm * 4                              # acc + ssq
    temps = tm * tk * 4 + 2 * tm * tn * 4                       # f32 upcast + dot temp
    return bufs + scratch + temps


def _make_kernel(in_dim, tk, need_k_mask, cache_norm):
    def kernel(x_ref, w_ref, o_ref, acc_ref, ssq_ref):
        j = pl.program_id(1)
        k = pl.program_id(2)
        nk = pl.num_programs(2)

        x = x_ref[...]
        w = w_ref[...]
        if need_k_mask:
            # Ragged K edge: zero lanes beyond in_dim so garbage never enters
            # the reductions (sum-of-squares and matmul).
            base = k * tk
            xcol = base + jax.lax.broadcasted_iota(jnp.int32, x.shape, 1)
            x = jnp.where(xcol < in_dim, x, jnp.zeros_like(x))
            wcol = base + jax.lax.broadcasted_iota(jnp.int32, w.shape, 1)
            w = jnp.where(wcol < in_dim, w, jnp.zeros_like(w))

        @pl.when(k == 0)
        def _():
            acc_ref[...] = jnp.zeros_like(acc_ref)

        if cache_norm:
            # Norm computed once per row tile (j == 0), reused for all other
            # output tiles of the same rows (j axis is "arbitrary").
            @pl.when((j == 0) & (k == 0))
            def _():
                ssq_ref[...] = jnp.zeros_like(ssq_ref)

            @pl.when(j == 0)
            def _():
                xf = x.astype(jnp.float32)
                ssq_ref[...] += jnp.sum(xf * xf, axis=-1, keepdims=True)
        else:
            # Recompute per output tile; keeps the j axis free to be
            # megacore-parallel (weight-dominated shapes, v7x).
            @pl.when(k == 0)
            def _():
                ssq_ref[...] = jnp.zeros_like(ssq_ref)

            xf = x.astype(jnp.float32)
            ssq_ref[...] += jnp.sum(xf * xf, axis=-1, keepdims=True)

        # x @ w.T on the MXU with f32 accumulation (weight kept un-transposed).
        acc_ref[...] += jax.lax.dot_general(
            x, w, (((1,), (1,)), ((), ())), preferred_element_type=jnp.float32
        )

        @pl.when(k == nk - 1)
        def _():
            # 1/max(||x||, eps) == rsqrt(max(||x||^2, eps^2)) -> single EUP op.
            inv = jax.lax.rsqrt(jnp.maximum(ssq_ref[...], _EPS * _EPS))
            o_ref[...] = (acc_ref[...] * inv).astype(o_ref.dtype)

    return kernel


def linear_head_forward(x, weight, *, block_m=None, block_n=None, block_k=None):
    """F.normalize(x, dim=-1, p=2) @ weight.T  (bias-free linear head).

    x: (..., in_dim); weight: (out_dim, in_dim) as in nn.Linear.
    block_* are optional overrides (mainly for tests); by default tiles are
    sized from the device's VMEM capacity.
    """
    in_dim = x.shape[-1]
    out_dim, w_in = weight.shape
    assert w_in == in_dim
    lead = x.shape[:-1]

    x2d = x.reshape(-1, in_dim)
    M = x2d.shape[0]

    xsz = x2d.dtype.itemsize
    wsz = weight.dtype.itemsize
    osz = x2d.dtype.itemsize

    # ---- Generation-aware VMEM budget (128 MiB v5e/v6e, 64 MiB v7x). ----
    try:
        vmem_cap = int(pltpu.get_tpu_info().vmem_capacity_bytes)
    except Exception:
        vmem_cap = 64 * 1024 * 1024  # safe lower bound for all generations
    budget = int(vmem_cap * 0.72)

    # ---- Tile selection (big tiles preferred; weight re-stream = W * M/tm). ----
    tm = _fit_block(512, M, 8)
    tn = _fit_block(1024, out_dim, 128)
    tk = in_dim  # whole reduction in one block whenever it fits

    while _footprint_bytes(tm, tn, tk, xsz, wsz, osz) > budget:
        if tn > 256 and tn > tm:
            tn = _fit_block(tn // 2, out_dim, 128)
        elif tk > 2048:
            tk = _fit_block(tk // 2, in_dim, 128)
        elif tm > 128:
            tm = _fit_block(tm // 2, M, 8)
        elif tn > 128:
            tn = _fit_block(tn // 2, out_dim, 128)
        elif tk > 512:
            tk = _fit_block(tk // 2, in_dim, 128)
        elif tm > 8:
            tm = _fit_block(tm // 2, M, 8)
        else:
            break  # smallest tiles; give Mosaic the whole limit and hope

    if block_m is not None:
        tm = block_m
    if block_n is not None:
        tn = block_n
    if block_k is not None:
        tk = block_k

    n_i = pl.cdiv(M, tm)
    n_j = pl.cdiv(out_dim, tn)
    n_k = pl.cdiv(in_dim, tk)
    need_k_mask = (tk < in_dim) and (in_dim % tk != 0)

    # Norm caching vs. megacore weight split: cache the row norm (j axis
    # "arbitrary") when activations dominate the HBM stream; otherwise keep
    # j "parallel" so a v7x megacore streams half the weight per core.
    x_bytes = M * in_dim * xsz
    w_bytes = out_dim * in_dim * wsz
    cache_norm = (n_j == 1) or (x_bytes >= w_bytes)
    dim_sems = ("parallel", "arbitrary" if cache_norm else "parallel", "arbitrary")

    vmem_limit = int(
        min(
            vmem_cap * 0.82,
            max(1.5 * _footprint_bytes(tm, tn, tk, xsz, wsz, osz), 32 * 1024 * 1024),
        )
    )

    kernel = _make_kernel(in_dim, tk, need_k_mask, cache_norm)

    out = pl.pallas_call(
        kernel,
        out_shape=jax.ShapeDtypeStruct((M, out_dim), x.dtype),
        grid_spec=pltpu.PrefetchScalarGridSpec(
            num_scalar_prefetch=0,
            grid=(n_i, n_j, n_k),
            in_specs=[
                pl.BlockSpec((tm, tk), lambda i, j, k: (i, k)),   # x rows
                pl.BlockSpec((tn, tk), lambda i, j, k: (j, k)),   # W rows (native layout)
            ],
            out_specs=pl.BlockSpec((tm, tn), lambda i, j, k: (i, j)),
            scratch_shapes=[
                pltpu.VMEM((tm, tn), jnp.float32),  # matmul accumulator
                pltpu.VMEM((tm, 1), jnp.float32),   # per-row sum of squares
            ],
        ),
        compiler_params=pltpu.CompilerParams(
            dimension_semantics=dim_sems,
            vmem_limit_bytes=vmem_limit,
        ),
    )(x2d, weight)

    return out.reshape(*lead, out_dim)


def _reference(x, weight):
    norm = jnp.sqrt(jnp.sum(x.astype(jnp.float32) ** 2, axis=-1, keepdims=True))
    x_n = x / jnp.maximum(norm, _EPS).astype(x.dtype)
    return x_n @ weight.T


if __name__ == "__main__":
    key = jax.random.PRNGKey(0)

    # --- Test 1: shapes implied by the module (batch=2, seq=8, in=32, out=16). ---
    B, S, IN_DIM, OUT_DIM = 2, 8, 32, 16
    kx, kw, key = jax.random.split(key, 3)
    x = jax.random.normal(kx, (B, S, IN_DIM), dtype=jnp.float32)
    w = jax.random.normal(kw, (OUT_DIM, IN_DIM), dtype=jnp.float32) / jnp.sqrt(IN_DIM)
    y = linear_head_forward(x, w)
    jax.block_until_ready(y)
    assert y.shape == (B, S, OUT_DIM)
    assert jnp.allclose(y, _reference(x, w), atol=1e-5, rtol=1e-5)

    # --- Test 2: ragged row count (exercises partial row tiles, norm caching). ---
    kx, kw, key = jax.random.split(key, 3)
    x2 = jax.random.normal(kx, (2, 350, 32), dtype=jnp.float32)
    w2 = jax.random.normal(kw, (16, 32), dtype=jnp.float32) / jnp.sqrt(32.0)
    y2 = linear_head_forward(x2, w2)
    jax.block_until_ready(y2)
    assert jnp.allclose(y2, _reference(x2, w2), atol=1e-5, rtol=1e-5)

    # --- Test 3: small blocks forced to exercise K tiling + ragged-K masking,
    #     ragged N/M edges, and the non-cached-norm (weight-dominated) path. ---
    kx, kw, key = jax.random.split(key, 3)
    x3 = jax.random.normal(kx, (20, 160), dtype=jnp.float32)
    w3 = jax.random.normal(kw, (272, 160), dtype=jnp.float32) / jnp.sqrt(160.0)
    y3 = linear_head_forward(x3, w3, block_m=8, block_n=128, block_k=128)
    jax.block_until_ready(y3)
    assert jnp.allclose(y3, _reference(x3, w3), atol=1e-5, rtol=1e-5)

    print("KERNEL_OK")
</pallas_src>

<mosaic_0001>
module attributes {stable_mosaic.version = 11 : i64} {
  func.func @kernel(%arg0: i32, %arg1: i32, %arg2: i32, %arg3: memref<16x32xf32, #tpu.memory_space<vmem>>, %arg4: memref<16x32xf32, #tpu.memory_space<vmem>>, %arg5: memref<16x16xf32, #tpu.memory_space<vmem>>, %arg6: memref<16x16xf32, #tpu.memory_space<vmem>>, %arg7: memref<16x1xf32, #tpu.memory_space<vmem>>) attributes {dimension_semantics = [#tpu.dimension_semantics<parallel>, #tpu.dimension_semantics<arbitrary>, #tpu.dimension_semantics<arbitrary>], iteration_bounds = array<i64: 1, 1, 1>, scalar_prefetch = 0 : i64, scratch_operands = 2 : i64, tpu.core_type = #tpu.core_type<tc>, window_params = [{transform_indices = @transform_0, window_bounds = array<i64: 16, 32>}, {transform_indices = @transform_1, window_bounds = array<i64: 16, 32>}, {transform_indices = @transform_2, window_bounds = array<i64: 16, 16>}]} {
    %c0 = arith.constant 0 : index
    %c0_0 = arith.constant 0 : index
    %0 = vector.load %arg3[%c0, %c0_0] : memref<16x32xf32, #tpu.memory_space<vmem>>, vector<16x32xf32>
    %c0_1 = arith.constant 0 : index
    %c0_2 = arith.constant 0 : index
    %1 = vector.load %arg4[%c0_1, %c0_2] : memref<16x32xf32, #tpu.memory_space<vmem>>, vector<16x32xf32>
    %c0_i32 = arith.constant 0 : i32
    %2 = arith.cmpi eq, %arg2, %c0_i32 : i32
    %3 = arith.extui %2 : i1 to i32
    %c0_i32_3 = arith.constant 0 : i32
    %4 = arith.cmpi ne, %3, %c0_i32_3 : i32
    scf.if %4 {
      %cst_15 = arith.constant 0.000000e+00 : f32
      %20 = vector.broadcast %cst_15 : f32 to vector<16x16xf32>
      %c0_16 = arith.constant 0 : index
      %c0_17 = arith.constant 0 : index
      %21 = vector.load %arg6[%c0_16, %c0_17] : memref<16x16xf32, #tpu.memory_space<vmem>>, vector<16x16xf32>
      tpu.vector_store %arg6[%c0_16, %c0_17], %20 {strides = array<i32>} : memref<16x16xf32, #tpu.memory_space<vmem>>, vector<16x16xf32>,
    } else {
    }
    %c0_i32_4 = arith.constant 0 : i32
    %5 = arith.cmpi eq, %arg1, %c0_i32_4 : i32
    %c0_i32_5 = arith.constant 0 : i32
    %6 = arith.cmpi eq, %arg2, %c0_i32_5 : i32
    %7 = arith.andi %5, %6 : i1
    %8 = arith.extui %7 : i1 to i32
    %c0_i32_6 = arith.constant 0 : i32
    %9 = arith.cmpi ne, %8, %c0_i32_6 : i32
    scf.if %9 {
      %cst_15 = arith.constant 0.000000e+00 : f32
      %20 = vector.broadcast %cst_15 : f32 to vector<16x1xf32>
      %c0_16 = arith.constant 0 : index
      %c0_17 = arith.constant 0 : index
      %21 = vector.load %arg7[%c0_16, %c0_17] : memref<16x1xf32, #tpu.memory_space<vmem>>, vector<16x1xf32>
      tpu.vector_store %arg7[%c0_16, %c0_17], %20 {strides = array<i32>} : memref<16x1xf32, #tpu.memory_space<vmem>>, vector<16x1xf32>,
    } else {
    }
    %c0_i32_7 = arith.constant 0 : i32
    %10 = arith.cmpi eq, %arg1, %c0_i32_7 : i32
    %11 = arith.extui %10 : i1 to i32
    %c0_i32_8 = arith.constant 0 : i32
    %12 = arith.cmpi ne, %11, %c0_i32_8 : i32
    scf.if %12 {
      %c0_15 = arith.constant 0 : index
      %c0_16 = arith.constant 0 : index
      %20 = vector.load %arg7[%c0_15, %c0_16] : memref<16x1xf32, #tpu.memory_space<vmem>>, vector<16x1xf32>
      %21 = arith.mulf %0, %0 : vector<16x32xf32>
      %cst_17 = arith.constant dense<0.000000e+00> : vector<16xf32>
      %22 = vector.multi_reduction <add>, %21, %cst_17 [1] : vector<16x32xf32> to vector<16xf32>
      %23 = vector.shape_cast %22 : vector<16xf32> to vector<16x1xf32>
      %24 = arith.addf %20, %23 : vector<16x1xf32>
      %c0_18 = arith.constant 0 : index
      %c0_19 = arith.constant 0 : index
      %25 = vector.load %arg7[%c0_18, %c0_19] : memref<16x1xf32, #tpu.memory_space<vmem>>, vector<16x1xf32>
      tpu.vector_store %arg7[%c0_18, %c0_19], %24 {strides = array<i32>} : memref<16x1xf32, #tpu.memory_space<vmem>>, vector<16x1xf32>,
    } else {
    }
    %c0_9 = arith.constant 0 : index
    %c0_10 = arith.constant 0 : index
    %13 = vector.load %arg6[%c0_9, %c0_10] : memref<16x16xf32, #tpu.memory_space<vmem>>, vector<16x16xf32>
    %cst = arith.constant dense<0.000000e+00> : vector<16x16xf32>
    %14 = tpu.matmul %0, %1, %cst {dimension_numbers = #tpu.dot_dimension_numbers<[1], [1], [0], [0], [0, 0, 1, 0], [], []>} : vector<16x32xf32>, vector<16x32xf32>, vector<16x16xf32> -> vector<16x16xf32>
    %15 = arith.addf %13, %14 : vector<16x16xf32>
    %c0_11 = arith.constant 0 : index
    %c0_12 = arith.constant 0 : index
    %16 = vector.load %arg6[%c0_11, %c0_12] : memref<16x16xf32, #tpu.memory_space<vmem>>, vector<16x16xf32>
    tpu.vector_store %arg6[%c0_11, %c0_12], %15 {strides = array<i32>} : memref<16x16xf32, #tpu.memory_space<vmem>>, vector<16x16xf32>,
    %c0_i32_13 = arith.constant 0 : i32
    %17 = arith.cmpi eq, %arg2, %c0_i32_13 : i32
    %18 = arith.extui %17 : i1 to i32
    %c0_i32_14 = arith.constant 0 : i32
    %19 = arith.cmpi ne, %18, %c0_i32_14 : i32
    scf.if %19 {
      %c0_15 = arith.constant 0 : index
      %c0_16 = arith.constant 0 : index
      %20 = vector.load %arg7[%c0_15, %c0_16] : memref<16x1xf32, #tpu.memory_space<vmem>>, vector<16x1xf32>
      %cst_17 = arith.constant 1.000000e-24 : f32
      %21 = vector.broadcast %cst_17 : f32 to vector<16x1xf32>
      %22 = arith.maximumf %20, %21 : vector<16x1xf32>
      %23 = math.rsqrt %22 : vector<16x1xf32>
      %c0_18 = arith.constant 0 : index
      %c0_19 = arith.constant 0 : index
      %24 = vector.load %arg6[%c0_18, %c0_19] : memref<16x16xf32, #tpu.memory_space<vmem>>, vector<16x16xf32>
      %25 = vector.broadcast %23 : vector<16x1xf32> to vector<16x16xf32>
      %26 = arith.mulf %24, %25 : vector<16x16xf32>
      %c0_20 = arith.constant 0 : index
      %c0_21 = arith.constant 0 : index
      %27 = vector.load %arg5[%c0_20, %c0_21] : memref<16x16xf32, #tpu.memory_space<vmem>>, vector<16x16xf32>
      tpu.vector_store %arg5[%c0_20, %c0_21], %26 {strides = array<i32>} : memref<16x16xf32, #tpu.memory_space<vmem>>, vector<16x16xf32>,
    } else {
    }
    return
  }
  func.func @transform_0(%arg0: i32, %arg1: i32, %arg2: i32) -> (i32, i32) {
    %c0_i32 = arith.constant 0 : i32
    return %arg0, %arg2 : i32, i32
  }
  func.func @transform_1(%arg0: i32, %arg1: i32, %arg2: i32) -> (i32, i32) {
    %c0_i32 = arith.constant 0 : i32
    return %arg1, %arg2 : i32, i32
  }
  func.func @transform_2(%arg0: i32, %arg1: i32, %arg2: i32) -> (i32, i32) {
    %c0_i32 = arith.constant 0 : i32
    return %arg0, %arg1 : i32, i32
  }
}

</mosaic_0001>

<bundles_post_ra>
// kernel: tpu_custom_call.1
= control target key start
LH: loop header
LB: loop body
LE: loop exit
PB: predicated region body
PF: predicated region fallthrough
CT: control target
= control target key end

     0   :  { %7 = vsyncpa [#allocation5], 0  ;;  %s335_s0 = inlined_call_operand.hbm [shape: f32[16,32], index: 0, kind: input, shape index: {}]   ;;  %s336_s1 = inlined_call_operand.hbm [shape: f32[16,32], index: 1, kind: input, shape index: {}]   ;;  %s337_s2 = inlined_call_operand.hbm [shape: f32[16,16], index: 2, kind: output, shape index: {}]  }
   0x1   :  { %8 = vsyncpa [#allocation8], 0 }
   0x2   :  { %9 = vsyncpa [#allocation6], 0  ;;  %s14_s11 = sshll.u32 %s335_s0, 4  ;;  %s285_s12 = smov [#allocation4]   ;;  %s15_s11 = int_to_ptr.hbm [resolvable:$true] %s14_s11 }
   0x3   :  { %s16_s13 = sshll.u32 %s285_s12, 4  ;;  %s27_s16 = sshll.u32 %s336_s1, 4  ;;  %s17_s13 = int_to_ptr.vmem [resolvable:$true] %s16_s13  ;;  %s28_s16 = int_to_ptr.hbm [resolvable:$true] %s27_s16 }
   0x4   :  { %s286_s17 = smov 128   ;;  %s287_s18 = smov 8  }
   0x5   :  { %22 = dma.hbm_to_vmem [thread:$0]  %s15_s11, 256, %s17_s13, [#allocation5], %s286_s17, %s286_s17, %s287_s18  }
   0x6   :  { %s288_s19 = smov [#allocation7]  }
   0x7   :  { %s29_s20 = sshll.u32 %s288_s19, 4  ;;  %s30_s20 = int_to_ptr.vmem [resolvable:$true] %s29_s20 }
   0x8   :  { %35 = dma.hbm_to_vmem [thread:$0]  %s28_s16, 256, %s30_s20, [#allocation8], %s286_s17, %s286_s17, %s287_s18  }
   0x9   :  { %279 = dma.done.wait [#allocation5], 256  }
   0xa   :  { %280 = vsyncadd [#allocation5], 4294967040 }
   0xb   :  { %281 = dma.done.wait [#allocation8], 256  }
   0xc   :  { %282 = vsyncadd [#allocation8], 4294967040  ;;  %vm60_vm0 = vcmask 7168   ;;  %v289_v0 = vmov 0.0   ;;  %v44_v1 = vld [vmem:[#allocation4] sm:$0xff]  ;;  %vm70_vm1 = vcmask 261120  }
   0xd   :  { %61 = vst.msk [vmem:[#allocation3] sm:$0xff] %vm60_vm0, %v289_v0  ;;  %v68_v2 = vmul.f32 %v44_v1, %v44_v1  ;;  %v45_v3 = vld [vmem:[#allocation4 + $0x8] sm:$0xff]  ;;  %v47_v7 = vld [vmem:[#allocation7 + $0x8] sm:$0xff]  ;;  %v46_v8 = vld [vmem:[#allocation7] sm:$0xff]  ;;  %v290_v9 = vmov 0   ;;  %vm52_vm2 = vcmask 130048  }
   0xe   :  { %62 = vst.msk [vmem:[#allocation3 + $0x8] sm:$0xff] %vm60_vm0, %v289_v0  ;;  %v69_v5 = vmul.f32 %v45_v3, %v45_v3  ;;  %188 = vmatpush.xpose.msk.msra.mxu0 %vm70_vm1, %v47_v7  ;;  %192 = vmatpush.xpose.msk.msra.mxu1 %vm70_vm1, %v47_v7  ;;  %s291_s0 = smov [#allocation9]   ;;  %s174_s23 = sshll.u32 %s337_s2, 4  ;;  %s175_s23 = int_to_ptr.hbm [resolvable:$true] %s174_s23 }
   0xf   :  { %v71_v4 = vsel %vm70_vm1, %v68_v2, 0.0  ;;  %201 = vset.pattern.permute.xlu1 %v290_v9  ;;  %202 = vset.pattern.permute.xlu0 %v290_v9  ;;  %53 = vst.msk [vmem:[#allocation2] sm:$0xff] %vm52_vm2, %v289_v0  ;;  %s172_s1 = sshll.u32 %s291_s0, 4  ;;  %s173_s1 = int_to_ptr.vmem [resolvable:$true] %s172_s1 }
  0x10   :  { %72 = vadd.xlane.f32.xlu0 %v71_v4  ;;  %v74_v6 = vsel %vm70_vm1, %v69_v5, 0.0  ;;  %54 = vst.msk [vmem:[#allocation2 + $0x8] sm:$0xff] %vm52_vm2, %v289_v0 }
  0x12   :  { %189 = vmatpush.xpose.msk.msra.mxu0 %vm70_vm1, %v46_v8  ;;  %193 = vmatpush.xpose.msk.msra.mxu1 %vm70_vm1, %v46_v8 }
  0x14   :  { %v66_v10 = vld [vmem:[#allocation3] sm:$0xff] }
  0x15   :  { %190 = vmatmul.msk.f32.vlgmr.msra.gmra.mxu0 %vm70_vm1, %v44_v1  ;;  %191 = vmatmul.msk.f32.vlgmr.msra.gmra.mxu1 %vm70_vm1, %v45_v3  ;;  %v67_v13 = vld [vmem:[#allocation3 + $0x8] sm:$0xff] }
  0x16   :  { %v82_v34 = vld [vmem:[#allocation2] sm:$0xff] }
  0x17   :  { %v83_v35 = vld [vmem:[#allocation2 + $0x8] sm:$0xff] }
  0x18   :  { %75 = vadd.xlane.f32.xlu0 %v74_v6 }
  0x83   :  { %v73_v11 = vpop.xlane.xlu0 %72 }
  0x84   :  { %v77_v12 = vadd.f32 %v73_v11, %v66_v10 }
  0x86   :  { %80 = vst.msk [vmem:[#allocation3] sm:$0xff] %vm60_vm0, %v77_v12 }
  0x8b   :  { %v76_v14 = vpop.xlane.xlu0 %75 }
  0x8c   :  { %v78_v15 = vadd.f32 %v76_v14, %v67_v13 }
  0x8d   :  { %v128_v16 = vld [vmem:[#allocation3] sm:$0xff] }
  0x8e   :  { %81 = vst.msk [vmem:[#allocation3 + $0x8] sm:$0xff] %vm60_vm0, %v78_v15  ;;  %v130_v17 = vmax.f32 %v128_v16, 1e-24 }
  0x90   :  { %203 = vrsqrt.f32 %v130_v17  ;;  %vm138_vm4 = vweird.f32 %v130_v17 }
  0x92   :  { %v114_v36 = vpop.f32.mrf.mxu0  ;;  %v117_v37 = vpop.f32.mrf.mxu1 }
  0x93   :  { %v120_v38 = vadd.f32 %v114_v36, %v82_v34  ;;  %v121_v39 = vadd.f32 %v117_v37, %v83_v35 }
  0x95   :  { %v129_v18 = vld [vmem:[#allocation3 + $0x8] sm:$0xff]  ;;  %123 = vst.msk [vmem:[#allocation2] sm:$0xff] %vm52_vm2, %v120_v38 }
  0x96   :  { %v204_v19 = vpop.eup %203  ;;  %v131_v20 = vmax.f32 %v129_v18, 1e-24  ;;  %124 = vst.msk [vmem:[#allocation2 + $0x8] sm:$0xff] %vm52_vm2, %v121_v39 }
  0x97   :  { %v133_v21 = vmul.f32 %v204_v19, %v130_v17  ;;  %vm139_vm3 = vweird.f32 %v204_v19 }
  0x98   :  { %205 = vrsqrt.f32 %v131_v20  ;;  %vm140_vm5 = vmor %vm138_vm4, %vm139_vm3  ;;  %vm148_vm7 = vweird.f32 %v131_v20 }
  0x99   :  { %v134_v22 = vmul.f32 %v204_v19, %v133_v21 }
  0x9b   :  { %v135_v23 = vmul.f32 0.5, %v134_v22 }
  0x9c   :  { %v152_v40 = vld [vmem:[#allocation2] sm:$0xff] }
  0x9d   :  { %v136_v24 = vsub.f32 1.5, %v135_v23  ;;  %v153_v43 = vld [vmem:[#allocation2 + $0x8] sm:$0xff] }
  0x9e   :  { %v206_v25 = vpop.eup %205 }
  0x9f   :  { %v137_v26 = vmul.f32 %v204_v19, %v136_v24  ;;  %v143_v27 = vmul.f32 %v206_v25, %v131_v20  ;;  %vm149_vm6 = vweird.f32 %v206_v25 }
  0xa0   :  { %vm150_vm8 = vmor %vm148_vm7, %vm149_vm6 }
  0xa1   :  { %v141_v28 = vsel %vm140_vm5, %v204_v19, %v137_v26  ;;  %v144_v29 = vmul.f32 %v206_v25, %v143_v27 }
  0xa2   :  { %156 = vperm.xlu1 %201, %v141_v28  }
  0xa3   :  { %v145_v30 = vmul.f32 0.5, %v144_v29 }
  0xa5   :  { %v146_v31 = vsub.f32 1.5, %v145_v30 }
  0xa7   :  { %v147_v32 = vmul.f32 %v206_v25, %v146_v31 }
  0xa9   :  { %v151_v33 = vsel %vm150_vm8, %v206_v25, %v147_v32 }
  0xaa   :  { %161 = vperm.xlu1 %201, %v151_v33  }
 0x114   :  { %v157_v41 = vpop.permute.xlu1 %156 }
 0x115   :  { %v164_v42 = vmul.f32 %v157_v41, %v152_v40 }
 0x117   :  { %166 = vst.msk [vmem:[#allocation9] sm:$0xff] %vm52_vm2, %v164_v42 }
 0x11c   :  { %v162_v44 = vpop.permute.xlu1 %161 }
 0x11d   :  { %v165_v45 = vmul.f32 %v162_v44, %v153_v43 }
 0x11f   :  { %167 = vst.msk [vmem:[#allocation9 + $0x8] sm:$0xff] %vm52_vm2, %v165_v45 }
 0x120   :  { %180 = dma.vmem_to_hbm [thread:$0]  %s173_s1, 256, %s175_s23, [#allocation6], %s286_s17, %s286_s17, %s287_s18  }
 0x121   :  { %283 = dma.done.wait [#allocation6], 256  }
 0x122   :  { %284 = vsyncadd [#allocation6], 4294967040 }
 0x123   :  { %185 = vsyncpa [#allocation5], 1 }
 0x124   :  { %186 = vsyncpa [#allocation8], 1 }
 0x125   :  { %187 = vsyncpa [#allocation6], 1 }

</bundles_post_ra>
